<compile_context>
chip_gen: v6e
topology: v6e:2x2x1
jax: 0.10.0
libtpu: 0.0.40
codegen_flags: <defaults>
</compile_context>

<pallas_src>
import jax
import jax.numpy as jnp
from jax.experimental import pallas as pl
from jax.experimental.pallas import tpu as pltpu


def _siamese_kernel(x_ref, w1_ref, b1_ref, w2_ref, b2_ref, o_ref):
    # x_ref:  (M, D) f32   (M = 2B for forward(), M = B for get_embedding())
    # w1_ref: (D, H) bf16, b1_ref: (1, H) f32
    # w2_ref: (H, E) bf16, b2_ref: (1, E) f32
    # o_ref:  (M, E) f32
    x = x_ref[...].astype(jnp.bfloat16)                       # in-kernel cast (VPU)
    h = jnp.dot(x, w1_ref[...], preferred_element_type=jnp.float32)
    h = jnp.maximum(h + b1_ref[...], 0.0)                     # (M, H) f32
    o = jnp.dot(h.astype(w2_ref.dtype), w2_ref[...],
                preferred_element_type=jnp.float32)
    o_ref[...] = (o + b2_ref[...]).astype(o_ref.dtype)        # (M, E) f32


def _embed_flat(x_flat, w1, b1, w2, b2):
    """Shared embedding net over a flat (M, D) f32 batch -> (M, E) f32.

    Single pallas_call, no grid: every operand is a full-array VMEM block.
    """
    M, _ = x_flat.shape
    E = w2.shape[1]
    vmem = pl.BlockSpec(memory_space=pltpu.MemorySpace.VMEM)
    return pl.pallas_call(
        _siamese_kernel,
        out_shape=jax.ShapeDtypeStruct((M, E), jnp.float32),
        in_specs=[vmem, vmem, vmem, vmem, vmem],
        out_specs=vmem,
    )(x_flat, w1, b1, w2, b2)


def prepare_params(params):
    """One-time parameter conversion (call OUTSIDE the hot path).

    Stores the matmul weights persistently in bf16 (MXU-native, halves W1 HBM
    bytes) and biases in f32.
    """
    w1, b1, w2, b2 = params
    return (jnp.asarray(w1, jnp.bfloat16), jnp.asarray(b1, jnp.float32),
            jnp.asarray(w2, jnp.bfloat16), jnp.asarray(b2, jnp.float32))


def siamese_forward(prepared_params, x1, x2):
    """SiameseNet.forward: the SAME embedding net applied to both inputs."""
    w1, b1, w2, b2 = prepared_params
    B = x1.shape[0]
    # Branches merged into the M dimension of a single matmul chain.
    x = jnp.concatenate(
        [x1.reshape(B, -1), x2.reshape(B, -1)], axis=0).astype(jnp.float32)
    out = _embed_flat(x, w1, b1, w2, b2)                       # (2B, E) f32
    return out[:B], out[B:]


def get_embedding(prepared_params, x):
    """SiameseNet.get_embedding"""
    w1, b1, w2, b2 = prepared_params
    B = x.shape[0]
    xf = x.reshape(B, -1).astype(jnp.float32)
    return _embed_flat(xf, w1, b1, w2, b2)


def _reference_embed_f32(x_flat, w1, b1, w2, b2):
    h = jnp.maximum(x_flat @ w1 + b1, 0.0)
    return h @ w2 + b2


def _reference_embed_bf16(x_flat, w1, b1, w2, b2):
    # Mirrors the kernel's numerics: bf16 matmul operands, f32 accumulation.
    xb = x_flat.astype(jnp.bfloat16)
    w1b = w1.astype(jnp.bfloat16)
    w2b = w2.astype(jnp.bfloat16)
    h = jnp.dot(xb, w1b, preferred_element_type=jnp.float32) + b1
    h = jnp.maximum(h, 0.0)
    return jnp.dot(h.astype(jnp.bfloat16), w2b,
                   preferred_element_type=jnp.float32) + b2


if __name__ == "__main__":
    # Small shapes: batch=2, channels=4, spatial=16x16, hidden=128, embed=32.
    B, C, Hs, Ws = 2, 4, 16, 16
    D = C * Hs * Ws          # 1024 flattened features
    HID, EMB = 128, 32

    key = jax.random.PRNGKey(0)
    k_x1, k_x2, k_w1, k_b1, k_w2, k_b2 = jax.random.split(key, 6)

    x1 = jax.random.normal(k_x1, (B, C, Hs, Ws), dtype=jnp.float32)
    x2 = jax.random.normal(k_x2, (B, C, Hs, Ws), dtype=jnp.float32)

    # Deterministic parameter init (shared between the two branches).
    w1 = jax.random.normal(k_w1, (D, HID), dtype=jnp.float32) * (1.0 / jnp.sqrt(D))
    b1 = jax.random.normal(k_b1, (1, HID), dtype=jnp.float32) * 0.01
    w2 = jax.random.normal(k_w2, (HID, EMB), dtype=jnp.float32) * (1.0 / jnp.sqrt(HID))
    b2 = jax.random.normal(k_b2, (1, EMB), dtype=jnp.float32) * 0.01
    params = (w1, b1, w2, b2)

    # One-time (off the hot path) weight conversion to bf16.
    pparams = jax.tree.map(jax.block_until_ready, prepare_params(params))

    out1, out2 = jax.jit(siamese_forward)(pparams, x1, x2)
    out1 = jax.block_until_ready(out1)
    out2 = jax.block_until_ready(out2)
    emb = jax.block_until_ready(jax.jit(get_embedding)(pparams, x1))

    # Sanity checks: tight vs a bf16-mirroring reference, loose vs full f32.
    x1f, x2f = x1.reshape(B, -1), x2.reshape(B, -1)
    ref1_b = _reference_embed_bf16(x1f, *params)
    ref2_b = _reference_embed_bf16(x2f, *params)
    ref1_f = _reference_embed_f32(x1f, *params)
    ref2_f = _reference_embed_f32(x2f, *params)

    assert out1.shape == (B, EMB) and out2.shape == (B, EMB)
    assert out1.dtype == jnp.float32 and out2.dtype == jnp.float32
    assert jnp.allclose(out1, ref1_b, atol=1e-2, rtol=1e-2)
    assert jnp.allclose(out2, ref2_b, atol=1e-2, rtol=1e-2)
    assert jnp.allclose(out1, ref1_f, atol=8e-2, rtol=8e-2)
    assert jnp.allclose(out2, ref2_f, atol=8e-2, rtol=8e-2)
    # Shared-weight branch == get_embedding on the same input.
    assert jnp.allclose(emb, out1, atol=1e-6, rtol=1e-6)

    print("KERNEL_OK")
</pallas_src>

<mosaic_0001>
module attributes {stable_mosaic.version = 11 : i64} {
  func.func @_siamese_kernel(%arg0: memref<4x1024xf32, #tpu.memory_space<vmem>>, %arg1: memref<1024x128xbf16, #tpu.memory_space<vmem>>, %arg2: memref<1x128xf32, #tpu.memory_space<vmem>>, %arg3: memref<128x32xbf16, #tpu.memory_space<vmem>>, %arg4: memref<1x32xf32, #tpu.memory_space<vmem>>, %arg5: memref<4x32xf32, #tpu.memory_space<vmem>>) attributes {dimension_semantics = [], scalar_prefetch = 0 : i64, scratch_operands = 0 : i64, tpu.core_type = #tpu.core_type<tc>} {
    %c0 = arith.constant 0 : index
    %c0_0 = arith.constant 0 : index
    %0 = vector.load %arg0[%c0, %c0_0] : memref<4x1024xf32, #tpu.memory_space<vmem>>, vector<4x1024xf32>
    %1 = arith.truncf %0 : vector<4x1024xf32> to vector<4x1024xbf16>
    %c0_1 = arith.constant 0 : index
    %c0_2 = arith.constant 0 : index
    %2 = vector.load %arg1[%c0_1, %c0_2] : memref<1024x128xbf16, #tpu.memory_space<vmem>>, vector<1024x128xbf16>
    %cst = arith.constant dense<0.000000e+00> : vector<4x128xf32>
    %3 = tpu.matmul %1, %2, %cst {dimension_numbers = #tpu.dot_dimension_numbers<[1], [0], [0], [1], [0, 0, 1, 1], [], []>} : vector<4x1024xbf16>, vector<1024x128xbf16>, vector<4x128xf32> -> vector<4x128xf32>
    %c0_3 = arith.constant 0 : index
    %c0_4 = arith.constant 0 : index
    %4 = vector.load %arg2[%c0_3, %c0_4] : memref<1x128xf32, #tpu.memory_space<vmem>>, vector<1x128xf32>
    %5 = vector.broadcast %4 : vector<1x128xf32> to vector<4x128xf32>
    %6 = arith.addf %3, %5 : vector<4x128xf32>
    %cst_5 = arith.constant 0.000000e+00 : f32
    %7 = vector.broadcast %cst_5 : f32 to vector<4x128xf32>
    %8 = arith.maximumf %6, %7 : vector<4x128xf32>
    %9 = arith.truncf %8 : vector<4x128xf32> to vector<4x128xbf16>
    %c0_6 = arith.constant 0 : index
    %c0_7 = arith.constant 0 : index
    %10 = vector.load %arg3[%c0_6, %c0_7] : memref<128x32xbf16, #tpu.memory_space<vmem>>, vector<128x32xbf16>
    %cst_8 = arith.constant dense<0.000000e+00> : vector<4x32xf32>
    %11 = tpu.matmul %9, %10, %cst_8 {dimension_numbers = #tpu.dot_dimension_numbers<[1], [0], [0], [1], [0, 0, 1, 1], [], []>} : vector<4x128xbf16>, vector<128x32xbf16>, vector<4x32xf32> -> vector<4x32xf32>
    %c0_9 = arith.constant 0 : index
    %c0_10 = arith.constant 0 : index
    %12 = vector.load %arg4[%c0_9, %c0_10] : memref<1x32xf32, #tpu.memory_space<vmem>>, vector<1x32xf32>
    %13 = vector.broadcast %12 : vector<1x32xf32> to vector<4x32xf32>
    %14 = arith.addf %11, %13 : vector<4x32xf32>
    %c0_11 = arith.constant 0 : index
    %c0_12 = arith.constant 0 : index
    %15 = vector.load %arg5[%c0_11, %c0_12] : memref<4x32xf32, #tpu.memory_space<vmem>>, vector<4x32xf32>
    tpu.vector_store %arg5[%c0_11, %c0_12], %14 {strides = array<i32>} : memref<4x32xf32, #tpu.memory_space<vmem>>, vector<4x32xf32>,
    return
  }
}

</mosaic_0001>

<bundles_post_ra>
// kernel: siamese_forward.1
= control target key start
LH: loop header
LB: loop body
LE: loop exit
PB: predicated region body
PF: predicated region fallthrough
CT: control target
= control target key end

     0   :  { %10 = vsyncpa [#allocation3], 0  ;;  %s1152_s18 = smov [#allocation2]   ;;  %s1235_s0 = inlined_call_operand.vmem [shape: f32[4,1024], index: 0, kind: input, shape index: {}]   ;;  %s1236_s1 = inlined_call_operand.hbm [shape: bf16[1024,128], index: 1, kind: input, shape index: {}]   ;;  %s1237_s2 = inlined_call_operand.vmem [shape: f32[1,128], index: 2, kind: input, shape index: {}]   ;;  %s1238_s3 = inlined_call_operand.vmem [shape: bf16[128,32], index: 3, kind: input, shape index: {}]   ;;  %s1239_s4 = inlined_call_operand.vmem [shape: f32[1,32], index: 4, kind: input, shape index: {}]   ;;  %s1240_s5 = inlined_call_operand.vmem [shape: f32[4,32], index: 5, kind: output, shape index: {}]  }
   0x1   :  { %s18_s19 = sshll.u32 %s1152_s18, 4  ;;  %s19_s19 = int_to_ptr.vmem [resolvable:$true] %s18_s19 }
   0x2   :  { %s1138_s20 = scalar_lea.vmem %s19_s19, 8192  ;;  %p1143_p1 = scmp.lt.s32.totalorder %s19_s19, %s19_s19 }
   0x3   :  { %p1139_p0 = scmp.ne.s32.totalorder %s19_s19, %s1138_s20  ;;  %p1144_p2 = scmp.lt.s32.totalorder %s1138_s20, %s1138_s20 }
   0x5   :  { %p1145_p3 = por %p1144_p2, %p1143_p1 }
   0x7   :  { %p1146_p4 = pnand %p1145_p3, %p1139_p0 }
   0x9   :  { %1149 = shalt.err (!%p1146_p4)
}
   0xa   :  { %s1153_s21 = smov 64   ;;  %s1154_s22 = smov 4  }
   0xb   :  { %24 = dma.hbm_to_vmem [thread:$0]  %s1236_s1, 8192, %s19_s19, [#allocation3], %s1153_s21, %s1153_s21, %s1154_s22  }
   0xc   :  { %1150 = dma.done.wait [#allocation3], 8192  }
   0xd   :  { %1151 = vsyncadd [#allocation3], 4294959104  ;;  %v1054_v0 = vld [vmem:[#allocation2 + $0x78] sm:$0xff]   ;;  %v1058_v4 = vld [vmem:[#allocation2 + $0x70] sm:$0xff]   ;;  %vm1156_vm0 = vmmov 0   ;;  %vm851_vm1 = vcmask 257024  }
   0xe   :  { %v1055_v1 = vld [vmem:[#allocation2 + $0xf8] sm:$0xff]   ;;  %932 = vmatprep.subr.bf16.mxu0 %v1054_v0  ;;  %v1059_v5 = vld [vmem:[#allocation2 + $0xf0] sm:$0xff]   ;;  %v1062_v8 = vld [vmem:[#allocation2 + $0x68] sm:$0xff]  }
   0xf   :  { %v1056_v2 = vld [vmem:[#allocation2 + $0x38] sm:$0xff]   ;;  %954 = vmatprep.subr.bf16.mxu1 %v1055_v1  ;;  %v1060_v6 = vld [vmem:[#allocation2 + $0x30] sm:$0xff]   ;;  %v1063_v9 = vld [vmem:[#allocation2 + $0xe8] sm:$0xff]  }
  0x10   :  { %v1057_v3 = vld [vmem:[#allocation2 + $0xb8] sm:$0xff]   ;;  %933 = vmatpush3.bf16.msra.mxu0 %v1056_v2  ;;  %v1061_v7 = vld [vmem:[#allocation2 + $0xb0] sm:$0xff]   ;;  %v1064_v10 = vld [vmem:[#allocation2 + $0x28] sm:$0xff]  }
  0x11   :  { %955 = vmatpush3.bf16.msra.mxu1 %v1057_v3  ;;  %934 = vmatprep.subr.bf16.mxu0 %v1058_v4  ;;  %v1065_v11 = vld [vmem:[#allocation2 + $0xa8] sm:$0xff]   ;;  %v1066_v12 = vld [vmem:[#allocation2 + $0x60] sm:$0xff]   ;;  %v1070_v16 = vld [vmem:[#allocation2 + $0x58] sm:$0xff]  }
  0x12   :  { %956 = vmatprep.subr.bf16.mxu1 %v1059_v5  ;;  %v1067_v13 = vld [vmem:[#allocation2 + $0xe0] sm:$0xff]   ;;  %v1071_v17 = vld [vmem:[#allocation2 + $0xd8] sm:$0xff]   ;;  %v1074_v20 = vld [vmem:[#allocation2 + $0x50] sm:$0xff]  }
  0x13   :  { %v1068_v14 = vld [vmem:[#allocation2 + $0x20] sm:$0xff]   ;;  %v1072_v18 = vld [vmem:[#allocation2 + $0x18] sm:$0xff]   ;;  %v1075_v21 = vld [vmem:[#allocation2 + $0xd0] sm:$0xff]  }
  0x14   :  { %935 = vmatpush3.bf16.msra.mxu0 %v1060_v6  ;;  %v1069_v15 = vld [vmem:[#allocation2 + $0xa0] sm:$0xff]   ;;  %v1073_v19 = vld [vmem:[#allocation2 + $0x98] sm:$0xff]   ;;  %v1076_v22 = vld [vmem:[#allocation2 + $0x10] sm:$0xff]  }
  0x15   :  { %957 = vmatpush3.bf16.msra.mxu1 %v1061_v7  ;;  %936 = vmatprep.subr.bf16.mxu0 %v1062_v8  ;;  %v1077_v23 = vld [vmem:[#allocation2 + $0x90] sm:$0xff]   ;;  %v1078_v24 = vld [vmem:[#allocation2 + $0x48] sm:$0xff]   ;;  %v1082_v28 = vld [vmem:[#allocation2 + $0x40] sm:$0xff]  }
  0x16   :  { %958 = vmatprep.subr.bf16.mxu1 %v1063_v9  ;;  %v1079_v25 = vld [vmem:[#allocation2 + $0xc8] sm:$0xff]   ;;  %v1083_v29 = vld [vmem:[#allocation2 + $0xc0] sm:$0xff]   ;;  %v1088_v36 = vld [vmem:[#allocation2 + $0x178] sm:$0xff]  }
  0x17   :  { %v1080_v26 = vld [vmem:[#allocation2 + $0x8] sm:$0xff]   ;;  %v1084_v30 = vld [vmem:[#allocation2] sm:$0xff]   ;;  %v1089_v39 = vld [vmem:[#allocation2 + $0x1f8] sm:$0xff]  }
  0x18   :  { %937 = vmatpush3.bf16.msra.mxu0 %v1064_v10  ;;  %v1081_v27 = vld [vmem:[#allocation2 + $0x88] sm:$0xff]   ;;  %v1085_v31 = vld [vmem:[#allocation2 + $0x80] sm:$0xff]   ;;  %v1090_v42 = vld [vmem:[#allocation2 + $0x138] sm:$0xff]  }
  0x19   :  { %959 = vmatpush3.bf16.msra.mxu1 %v1065_v11  ;;  %938 = vmatprep.subr.bf16.mxu0 %v1066_v12  ;;  %v35_v32 = vld [vmem:[%s1235_s0] sm:$0xff]  ;;  %v36_v33 = vld [vmem:[%s1235_s0 + $0x8] sm:$0xff]  ;;  %v1091_v43 = vld [vmem:[#allocation2 + $0x1b8] sm:$0xff]  }
  0x1a   :  { %960 = vmatprep.subr.bf16.mxu1 %v1067_v13  ;;  %v43_v34 = vcombine.high %v35_v32, %v35_v32  ;;  %v44_v35 = vcombine.high %v36_v33, %v36_v33  ;;  %v51_v37 = vpack.c.bf16 %v35_v32, %v35_v32  ;;  %v53_v38 = vpack.c.bf16 %v36_v33, %v36_v33  ;;  %v1092_v44 = vld [vmem:[#allocation2 + $0x170] sm:$0xff]   ;;  %v1096_v48 = vld [vmem:[#allocation2 + $0x168] sm:$0xff]   ;;  %v1100_v52 = vld [vmem:[#allocation2 + $0x160] sm:$0xff]  }
  0x1b   :  { %v1093_v45 = vld [vmem:[#allocation2 + $0x1f0] sm:$0xff]   ;;  %v1097_v49 = vld [vmem:[#allocation2 + $0x1e8] sm:$0xff]   ;;  %v1101_v53 = vld [vmem:[#allocation2 + $0x1e0] sm:$0xff]  }
  0x1c   :  { %939 = vmatpush3.bf16.msra.mxu0 %v1068_v14  ;;  %v52_v40 = vpack.c.bf16 %v43_v34, %v43_v34  ;;  %v54_v41 = vpack.c.bf16 %v44_v35, %v44_v35  ;;  %v1094_v46 = vld [vmem:[#allocation2 + $0x130] sm:$0xff]   ;;  %v1098_v50 = vld [vmem:[#allocation2 + $0x128] sm:$0xff]   ;;  %v1102_v54 = vld [vmem:[#allocation2 + $0x120] sm:$0xff]  }
  0x1d   :  { %961 = vmatpush3.bf16.msra.mxu1 %v1069_v15  ;;  %940 = vmatprep.subr.bf16.mxu0 %v1070_v16  ;;  %v1095_v47 = vld [vmem:[#allocation2 + $0x1b0] sm:$0xff]   ;;  %v1099_v51 = vld [vmem:[#allocation2 + $0x1a8] sm:$0xff]   ;;  %v1103_v55 = vld [vmem:[#allocation2 + $0x1a0] sm:$0xff]  }
  0x1e   :  { %962 = vmatprep.subr.bf16.mxu1 %v1071_v17  ;;  %610 = vmatprep.mubr.bf16.mxu0 %v52_v40  ;;  %v1104_v56 = vld [vmem:[#allocation2 + $0x158] sm:$0xff]   ;;  %v1108_v60 = vld [vmem:[#allocation2 + $0x150] sm:$0xff]   ;;  %v1112_v0 = vld [vmem:[#allocation2 + $0x148] sm:$0xff]   ;;  %v1155_v17 = vmov 0.0  }
  0x1f   :  { %650 = vmatprep.mubr.bf16.mxu1 %v54_v41  ;;  %v1105_v57 = vld [vmem:[#allocation2 + $0x1d8] sm:$0xff]   ;;  %v1109_v61 = vld [vmem:[#allocation2 + $0x1d0] sm:$0xff]   ;;  %v1113_v1 = vld [vmem:[#allocation2 + $0x1c8] sm:$0xff]  }
  0x20   :  { %941 = vmatpush3.bf16.msra.mxu0 %v1072_v18  ;;  %v1106_v58 = vld [vmem:[#allocation2 + $0x118] sm:$0xff]   ;;  %v1110_v62 = vld [vmem:[#allocation2 + $0x110] sm:$0xff]   ;;  %v1114_v2 = vld [vmem:[#allocation2 + $0x108] sm:$0xff]  }
  0x21   :  { %963 = vmatpush3.bf16.msra.mxu1 %v1073_v19  ;;  %942 = vmatprep.subr.bf16.mxu0 %v1074_v20  ;;  %v1107_v59 = vld [vmem:[#allocation2 + $0x198] sm:$0xff]   ;;  %v1111_v63 = vld [vmem:[#allocation2 + $0x190] sm:$0xff]   ;;  %v1115_v3 = vld [vmem:[#allocation2 + $0x188] sm:$0xff]  }
  0x22   :  { %964 = vmatprep.subr.bf16.mxu1 %v1075_v21  ;;  %v1116_v4 = vld [vmem:[#allocation2 + $0x140] sm:$0xff]   ;;  %v37_v8 = vld [vmem:[%s1235_s0 + $0x10] sm:$0xff]  ;;  %v38_v10 = vld [vmem:[%s1235_s0 + $0x18] sm:$0xff] }
  0x23   :  { %v1117_v5 = vld [vmem:[#allocation2 + $0x1c0] sm:$0xff]   ;;  %v45_v9 = vcombine.high %v37_v8, %v37_v8  ;;  %v55_v11 = vpack.c.bf16 %v37_v8, %v37_v8  ;;  %v46_v12 = vcombine.high %v38_v10, %v38_v10  ;;  %v57_v14 = vpack.c.bf16 %v38_v10, %v38_v10  ;;  %v1122_v16 = vld [vmem:[%s1238_s3 + $0x38] sm:$0xff]   ;;  %v1123_v18 = vld [vmem:[%s1238_s3 + $0x30] sm:$0xff]  }
  0x24   :  { %943 = vmatpush3.bf16.msra.mxu0 %v1076_v22  ;;  %v1118_v6 = vld [vmem:[#allocation2 + $0x100] sm:$0xff]   ;;  %v1124_v19 = vld [vmem:[%s1238_s3 + $0x28] sm:$0xff]   ;;  %v1126_v21 = vld [vmem:[%s1238_s3 + $0x18] sm:$0xff]  }
  0x25   :  { %965 = vmatpush3.bf16.msra.mxu1 %v1077_v23  ;;  %944 = vmatprep.subr.bf16.mxu0 %v1078_v24  ;;  %v1119_v7 = vld [vmem:[#allocation2 + $0x180] sm:$0xff]   ;;  %v56_v13 = vpack.c.bf16 %v45_v9, %v45_v9  ;;  %v58_v15 = vpack.c.bf16 %v46_v12, %v46_v12  ;;  %v1127_v22 = vld [vmem:[%s1238_s3 + $0x10] sm:$0xff]   ;;  %v1128_v23 = vld [vmem:[%s1238_s3 + $0x8] sm:$0xff]  }
  0x26   :  { %966 = vmatprep.subr.bf16.mxu1 %v1079_v25  ;;  %v1125_v20 = vld [vmem:[%s1238_s3 + $0x20] sm:$0xff]  }
  0x27   :  { %v1129_v24 = vld [vmem:[%s1238_s3] sm:$0xff]  }
  0x28   :  { %945 = vmatpush3.bf16.msra.mxu0 %v1080_v26  ;;  %v858_v34 = vld [vmem:[%s1237_s2] ss:$0 sm:$0xff] }
  0x29   :  { %967 = vmatpush3.bf16.msra.mxu1 %v1081_v27  ;;  %946 = vmatprep.subr.bf16.mxu0 %v1082_v28 }
  0x2a   :  { %968 = vmatprep.subr.bf16.mxu1 %v1083_v29 }
  0x2c   :  { %947 = vmatpush3.bf16.msra.mxu0 %v1084_v30 }
  0x2d   :  { %969 = vmatpush3.bf16.msra.mxu1 %v1085_v31  ;;  %976 = vmatprep.subr.bf16.mxu0 %v1088_v36 }
  0x2e   :  { %998 = vmatprep.subr.bf16.mxu1 %v1089_v39 }
  0x2f   :  { %611 = vmatmul.mubr.bf16.vlgmr.msra.gmra.mxu0 %v51_v37 }
  0x30   :  { %651 = vmatmul.mubr.bf16.vlgmr.msra.gmra.mxu1 %v53_v38  ;;  %977 = vmatpush3.bf16.msra.mxu0 %v1090_v42 }
  0x31   :  { %999 = vmatpush3.bf16.msra.mxu1 %v1091_v43  ;;  %978 = vmatprep.subr.bf16.mxu0 %v1092_v44 }
  0x32   :  { %1000 = vmatprep.subr.bf16.mxu1 %v1093_v45  ;;  %690 = vmatprep.mubr.bf16.mxu0 %v56_v13 }
  0x33   :  { %730 = vmatprep.mubr.bf16.mxu1 %v58_v15 }
  0x34   :  { %979 = vmatpush3.bf16.msra.mxu0 %v1094_v46 }
  0x35   :  { %1001 = vmatpush3.bf16.msra.mxu1 %v1095_v47  ;;  %980 = vmatprep.subr.bf16.mxu0 %v1096_v48 }
  0x36   :  { %1002 = vmatprep.subr.bf16.mxu1 %v1097_v49 }
  0x38   :  { %981 = vmatpush3.bf16.msra.mxu0 %v1098_v50 }
  0x39   :  { %1003 = vmatpush3.bf16.msra.mxu1 %v1099_v51  ;;  %982 = vmatprep.subr.bf16.mxu0 %v1100_v52  ;;  %v923_v52 = vld [vmem:[%s1239_s4] ss:$0 sm:$0xff] }
  0x3a   :  { %1004 = vmatprep.subr.bf16.mxu1 %v1101_v53 }
  0x3c   :  { %983 = vmatpush3.bf16.msra.mxu0 %v1102_v54 }
  0x3d   :  { %1005 = vmatpush3.bf16.msra.mxu1 %v1103_v55  ;;  %984 = vmatprep.subr.bf16.mxu0 %v1104_v56 }
  0x3e   :  { %1006 = vmatprep.subr.bf16.mxu1 %v1105_v57 }
  0x40   :  { %985 = vmatpush3.bf16.msra.mxu0 %v1106_v58 }
  0x41   :  { %1007 = vmatpush3.bf16.msra.mxu1 %v1107_v59  ;;  %986 = vmatprep.subr.bf16.mxu0 %v1108_v60 }
  0x42   :  { %1008 = vmatprep.subr.bf16.mxu1 %v1109_v61 }
  0x44   :  { %987 = vmatpush3.bf16.msra.mxu0 %v1110_v62 }
  0x45   :  { %1009 = vmatpush3.bf16.msra.mxu1 %v1111_v63  ;;  %988 = vmatprep.subr.bf16.mxu0 %v1112_v0 }
  0x46   :  { %1010 = vmatprep.subr.bf16.mxu1 %v1113_v1 }
  0x48   :  { %989 = vmatpush3.bf16.msra.mxu0 %v1114_v2 }
  0x49   :  { %1011 = vmatpush3.bf16.msra.mxu1 %v1115_v3  ;;  %990 = vmatprep.subr.bf16.mxu0 %v1116_v4 }
  0x4a   :  { %1012 = vmatprep.subr.bf16.mxu1 %v1117_v5 }
  0x4c   :  { %991 = vmatpush3.bf16.msra.mxu0 %v1118_v6 }
  0x4d   :  { %1013 = vmatpush3.bf16.msra.mxu1 %v1119_v7  ;;  %1029 = vmatprep.subr.bf16.mxu0 %v1155_v17 }
  0x4f   :  { %691 = vmatmul.mubr.bf16.vlgmr.msra.gmra.mxu0 %v55_v11 }
  0x50   :  { %731 = vmatmul.mubr.bf16.vlgmr.msra.gmra.mxu1 %v57_v14  ;;  %1030 = vmatpush3.bf16.msra.mxu0 %v1122_v16 }
  0x51   :  { %1031 = vmatprep.subr.bf16.mxu0 %v1155_v17  ;;  %1045 = vmatprep.mubr.msk.bf16.mxu0 %vm1156_vm0, %v1155_v17 }
  0x54   :  { %1032 = vmatpush3.bf16.msra.mxu0 %v1123_v18 }
  0x55   :  { %1033 = vmatprep.subr.bf16.mxu0 %v1155_v17 }
  0x58   :  { %1034 = vmatpush3.bf16.msra.mxu0 %v1124_v19 }
  0x59   :  { %1035 = vmatprep.subr.bf16.mxu0 %v1155_v17 }
  0x5c   :  { %1036 = vmatpush3.bf16.msra.mxu0 %v1125_v20 }
  0x5d   :  { %1037 = vmatprep.subr.bf16.mxu0 %v1155_v17 }
  0x60   :  { %1038 = vmatpush3.bf16.msra.mxu0 %v1126_v21 }
  0x61   :  { %1039 = vmatprep.subr.bf16.mxu0 %v1155_v17 }
  0x64   :  { %1040 = vmatpush3.bf16.msra.mxu0 %v1127_v22 }
  0x65   :  { %1041 = vmatprep.subr.bf16.mxu0 %v1155_v17 }
  0x68   :  { %1042 = vmatpush3.bf16.msra.mxu0 %v1128_v23 }
  0x69   :  { %1043 = vmatprep.subr.bf16.mxu0 %v1155_v17 }
  0x6c   :  { %1044 = vmatpush3.bf16.msra.mxu0 %v1129_v24 }
  0xef   :  { %v948_v25 = vpop.f32.mrf.mxu0 }
  0xf0   :  { %v970_v26 = vpop.f32.mrf.mxu1 }
  0xf1   :  { %v949_v27 = vpop.f32.mrf.mxu0 }
  0xf2   :  { %v971_v28 = vpop.f32.mrf.mxu1  ;;  %v950_v33 = vadd.f32 %v949_v27, %v948_v25 }
  0xf3   :  { %v951_v29 = vpop.f32.mrf.mxu0  ;;  %v972_v36 = vadd.f32 %v971_v28, %v970_v26 }
  0xf4   :  { %v973_v30 = vpop.f32.mrf.mxu1  ;;  %v613_v35 = vadd.f32 %v950_v33, %v858_v34 }
  0xf5   :  { %v952_v31 = vpop.f32.mrf.mxu0 }
  0xf6   :  { %v974_v32 = vpop.f32.mrf.mxu1  ;;  %v653_v40 = vadd.f32 %v972_v36, %v613_v35 }
 0x10f   :  { %v992_v37 = vpop.f32.mrf.mxu0 }
 0x110   :  { %v1014_v38 = vpop.f32.mrf.mxu1 }
 0x111   :  { %v993_v39 = vpop.f32.mrf.mxu0 }
 0x112   :  { %v994_v41 = vadd.f32 %v993_v39, %v992_v37  ;;  %v1015_v42 = vpop.f32.mrf.mxu1 }
 0x113   :  { %v995_v43 = vpop.f32.mrf.mxu0  ;;  %v1016_v45 = vadd.f32 %v1015_v42, %v1014_v38 }
 0x114   :  { %v693_v44 = vadd.f32 %v994_v41, %v653_v40  ;;  %v1017_v46 = vpop.f32.mrf.mxu1 }
 0x115   :  { %v996_v47 = vpop.f32.mrf.mxu0 }
 0x116   :  { %v733_v48 = vadd.f32 %v1016_v45, %v693_v44  ;;  %v1018_v49 = vpop.f32.mrf.mxu1 }
 0x118   :  { %v738_v50 = vmax.f32 %v733_v48, 0.0 }
 0x11a   :  { %v739_v51 = vpack.c.bf16 %v738_v50, %v738_v50 }
 0x11c   :  { %1046 = vmatmul.mubr.bf16.vlgmr.msra.gmra.mxu0 %v739_v51 }
 0x1dc   :  { %v845_v53 = vpop.f32.mrf.mxu0 }
 0x1dd   :  { %v846_v54 = vadd.f32 %v923_v52, %v845_v53 }
 0x1de   :  { %v1047_v55 = vpop.f32.mrf.mxu0 }
 0x1df   :  { %852 = vst.msk [vmem:[%s1240_s5] sm:$0xf] %vm851_vm1, %v846_v54 }
 0x1e0   :  { %v848_v56 = vpop.f32.mrf.mxu0 }
 0x1e2   :  { %v1048_v57 = vpop.f32.mrf.mxu0 }
 0x1e3   :  { %857 = vsyncpa [#allocation3], 1 }

</bundles_post_ra>
